<compile_context>
chip_gen: v6e
topology: v6e:2x2x1
jax: 0.10.0
libtpu: 0.0.40
codegen_flags: <defaults>
</compile_context>

<pallas_src>
import functools
import math

import jax
import jax.numpy as jnp
from jax.experimental import pallas as pl
from jax.experimental.pallas import tpu as pltpu


def _layernorm(x, gamma, beta, eps=1e-5):
    # torch.nn.LayerNorm semantics: biased variance over the last dim, f32 math.
    mean = jnp.mean(x, axis=-1, keepdims=True)
    var = jnp.mean((x - mean) ** 2, axis=-1, keepdims=True)
    return (x - mean) * jax.lax.rsqrt(var + eps) * gamma + beta


def _vmem_limit_bytes():
    # Raise above the 32 MiB scoped default on 128 MiB parts (v5e/v6e), stay
    # comfortably under v7x's 64 MiB physical VMEM.
    try:
        cap = int(getattr(pltpu.get_tpu_info(), "vmem_capacity_bytes",
                          128 * 1024 * 1024))
    except Exception:
        cap = 64 * 1024 * 1024
    return max(32 * 1024 * 1024, min(100 * 1024 * 1024, (cap * 3) // 4))


# ---------------------------------------------------------------------------
# Kernel 1: TokenEmbed + PositionEmbed + fused full-width Q/K/V projections,
#           tiled over sequence rows. Head split done here via lane-slice
#           stores (hidden under MXU work) so attention sees head-major data.
# ---------------------------------------------------------------------------
def embed_qkv_kernel(x_ref, embed_ref, pos_ref, wq_ref, wk_ref, wv_ref,
                     h_ref, q_ref, k_ref, v_ref,
                     *, num_heads, d_k, compute_dtype):
    f32 = jnp.float32
    x = x_ref[...].astype(compute_dtype)
    h = jnp.dot(x, embed_ref[...], preferred_element_type=f32) + pos_ref[...]
    h_ref[...] = h.astype(h_ref.dtype)

    hc = h.astype(compute_dtype)
    # Full-width (d_model x d_model) MXU matmuls (weights pre-cast on host).
    qf = jnp.dot(hc, wq_ref[...], preferred_element_type=f32)
    kf = jnp.dot(hc, wk_ref[...], preferred_element_type=f32)
    vf = jnp.dot(hc, wv_ref[...], preferred_element_type=f32)

    # Emit head-major (H, bs, d_k): per-head lane slices stored to distinct
    # leading indices — the attention kernel then needs no slicing / concat.
    for hd in range(num_heads):
        lo, hi = hd * d_k, (hd + 1) * d_k
        q_ref[hd] = qf[:, lo:hi].astype(q_ref.dtype)
        k_ref[hd] = kf[:, lo:hi].astype(k_ref.dtype)
        v_ref[hd] = vf[:, lo:hi].astype(v_ref.dtype)


# ---------------------------------------------------------------------------
# Kernel 2: batched multi-head attention + WO + LN1 + chunked FFN + LN2,
#           tiled over query rows; K/V (head-major, bf16) and weights resident.
# ---------------------------------------------------------------------------
def encoder_layer_kernel(h_ref, q_ref, k_ref, v_ref,
                         wo_ref, ln1_g_ref, ln1_b_ref,
                         w1_ref, b1_ref, w2_ref, b2_ref,
                         ln2_g_ref, ln2_b_ref,
                         out_ref, att_vmem,
                         *, num_heads, d_k, d_ff_chunk, compute_dtype):
    f32 = jnp.float32
    h = h_ref[...].astype(f32)          # (bs, d_model) residual
    q = q_ref[...]                      # (H, bs, d_k) bf16
    k = k_ref[...]                      # (H, n,  d_k) bf16 (all keys, resident)
    v = v_ref[...]                      # (H, n,  d_k) bf16

    # TODO(synk): key-tiled flash attention (online softmax, 'arbitrary' kv
    # grid axis) for long sequences where resident K/V / the (bs, n) scores
    # block no longer fit VMEM.
    scale = 1.0 / math.sqrt(d_k)
    s = jnp.einsum('hqd,hkd->hqk', q, k, preferred_element_type=f32) * scale
    s = s - jnp.max(s, axis=-1, keepdims=True)            # softmax over keys
    p = jnp.exp(s)
    p = p * pl.reciprocal(jnp.sum(p, axis=-1, keepdims=True), approx=True)
    att = jnp.einsum('hqk,hkd->hqd', p.astype(compute_dtype), v,
                     preferred_element_type=f32)           # (H, bs, d_k)

    # Scatter heads back to lane-packed layout via masked stores (no concat),
    # then hit WO with ONE full-width matmul.
    for hd in range(num_heads):
        att_vmem[:, hd * d_k:(hd + 1) * d_k] = att[hd]
    sa = jnp.dot(att_vmem[...].astype(compute_dtype), wo_ref[...],
                 preferred_element_type=f32)

    sa_out = _layernorm(sa + h, ln1_g_ref[...], ln1_b_ref[...])

    # PositionwiseFeedforward: Linear -> ReLU -> Linear, chunked over d_ff so
    # the (bs, d_ff) intermediate never materializes in VMEM.
    sa_c = sa_out.astype(compute_dtype)
    d_ff = w1_ref.shape[1]
    ff = jnp.zeros_like(sa)
    for c0 in range(0, d_ff, d_ff_chunk):
        c1 = c0 + d_ff_chunk
        t = (jnp.dot(sa_c, w1_ref[:, c0:c1], preferred_element_type=f32)
             + b1_ref[:, c0:c1])
        t = jnp.maximum(t, 0.0).astype(compute_dtype)
        ff = ff + jnp.dot(t, w2_ref[c0:c1, :], preferred_element_type=f32)
    ff = ff + b2_ref[...]

    out_ref[...] = _layernorm(ff + sa_out, ln2_g_ref[...], ln2_b_ref[...])


# ---------------------------------------------------------------------------
# Params + wrapper
# ---------------------------------------------------------------------------
def init_params(key, d_input, d_model, n_cxt, h, L):
    d_k = d_model // h
    d_ff = 4 * d_model
    keys = jax.random.split(key, 2 + L)
    embed = jax.random.normal(keys[0], (d_input, d_model), jnp.float32)
    pos = jax.random.normal(keys[1], (n_cxt, d_model), jnp.float32)
    layers = []
    for l in range(L):
        lk = jax.random.split(keys[2 + l], 8)
        layers.append(dict(
            # per-head (d_model, d_k) projections packed head-major along the
            # output axis -> full-width (d_model, d_model) MXU matmuls
            wq=jax.random.normal(lk[0], (d_model, d_model), jnp.float32),
            wk=jax.random.normal(lk[1], (d_model, d_model), jnp.float32),
            wv=jax.random.normal(lk[2], (d_model, d_model), jnp.float32),
            wo=jax.random.uniform(lk[3], (d_model, d_model), jnp.float32),
            ln1_g=jnp.ones((1, d_model), jnp.float32),
            ln1_b=jnp.zeros((1, d_model), jnp.float32),
            # nn.Linear weights kept pre-transposed to [in, out] so the kernel
            # computes x @ W (same math as x @ weight.T in PyTorch).
            w1=jax.random.normal(lk[4], (d_model, d_ff), jnp.float32)
               * (1.0 / math.sqrt(d_model)),
            b1=jax.random.normal(lk[5], (1, d_ff), jnp.float32) * 0.01,
            w2=jax.random.normal(lk[6], (d_ff, d_model), jnp.float32)
               * (1.0 / math.sqrt(d_ff)),
            b2=jax.random.normal(lk[7], (1, d_model), jnp.float32) * 0.01,
            ln2_g=jnp.ones((1, d_model), jnp.float32),
            ln2_b=jnp.zeros((1, d_model), jnp.float32),
        ))
    return dict(embed=embed, pos=pos, layers=layers)


def transformer_forward(x, params, *, num_heads, d_k, block_rows=256,
                        compute_dtype=jnp.bfloat16, d_ff_chunk=512):
    n, d_input = x.shape
    d_model = params['embed'].shape[1]
    d_ff = params['layers'][0]['w1'].shape[1]
    n_cxt = params['pos'].shape[0]
    assert n <= n_cxt and num_heads * d_k == d_model

    # ---- sequence tile (rows) --------------------------------------------
    bs = min(block_rows, n)
    # v7x has 2 TensorCores: make sure the "parallel" seq axis has >=2 steps.
    if bs == n and n >= 16 and (n // 2) % 8 == 0:
        bs = n // 2
    assert n % bs == 0 and (bs % 8 == 0 or bs == n)
    grid = (n // bs,)

    d_ff_chunk = min(d_ff_chunk, d_ff)
    assert d_ff % d_ff_chunk == 0

    cdt = jnp.dtype(compute_dtype)
    csize = cdt.itemsize

    # EncoderStack.forward applies every layer to the SAME embedded input and
    # returns only the last layer's output, so layers 0..L-2 are skipped
    # (numerically identical to the PyTorch module, no dead work).
    lp = params['layers'][-1]

    # ---- host-side weight prep: cast ONCE, kernels never re-cast -----------
    embed_c = params['embed'].astype(cdt)
    wq_c = lp['wq'].astype(cdt)
    wk_c = lp['wk'].astype(cdt)
    wv_c = lp['wv'].astype(cdt)
    wo_c = lp['wo'].astype(cdt)
    w1_c = lp['w1'].astype(cdt)
    w2_c = lp['w2'].astype(cdt)

    cparams = pltpu.CompilerParams(
        dimension_semantics=("parallel",),          # seq axis -> both TCs on v7x
        vmem_limit_bytes=_vmem_limit_bytes())

    def row_spec(cols):
        # activation tile: pipelined over the sequence grid
        return pl.BlockSpec((bs, cols), lambda i: (i, 0))

    def full2d(shape):
        # weights: same block every step -> resident in VMEM
        # TODO(synk): pipeline_mode=pl.Buffered(1) here to avoid double-
        # buffering constant blocks on v7x's 64 MiB VMEM.
        return pl.BlockSpec(shape, lambda i: (0, 0))

    head_tile = pl.BlockSpec((num_heads, bs, d_k), lambda i: (0, i, 0))
    head_full = pl.BlockSpec((num_heads, n, d_k), lambda i: (0, 0, 0))

    # ---- Kernel 1: embed + pos + fused Q/K/V (one pallas_call) -------------
    flops1 = 2 * n * d_input * d_model + 6 * n * d_model * d_model
    bytes1 = (n * d_input * 4 + n * d_model * 4
              + (d_input * d_model + 3 * d_model * d_model) * csize
              + 4 * n * d_model * csize)
    h, q, k, v = pl.pallas_call(
        functools.partial(embed_qkv_kernel, num_heads=num_heads, d_k=d_k,
                          compute_dtype=compute_dtype),
        out_shape=(jax.ShapeDtypeStruct((n, d_model), cdt),
                   jax.ShapeDtypeStruct((num_heads, n, d_k), cdt),
                   jax.ShapeDtypeStruct((num_heads, n, d_k), cdt),
                   jax.ShapeDtypeStruct((num_heads, n, d_k), cdt)),
        grid=grid,
        in_specs=[row_spec(d_input),
                  full2d((d_input, d_model)),
                  row_spec(d_model),            # slices only first n rows of pos
                  full2d((d_model, d_model)),
                  full2d((d_model, d_model)),
                  full2d((d_model, d_model))],
        out_specs=(row_spec(d_model), head_tile, head_tile, head_tile),
        cost_estimate=pl.CostEstimate(flops=int(flops1), transcendentals=0,
                                      bytes_accessed=int(bytes1)),
        compiler_params=cparams,
    )(x, embed_c, params['pos'], wq_c, wk_c, wv_c)

    # ---- Kernel 2: attention + WO + LN + FFN + LN, tiled over query rows ----
    flops2 = (4 * n * n * d_model            # scores + P@V over all heads
              + 2 * n * d_model * d_model    # WO
              + 4 * n * d_model * d_ff)      # FFN
    trans2 = num_heads * n * n + 4 * n
    bytes2 = (4 * n * d_model * csize
              + (d_model * d_model + 2 * d_model * d_ff) * csize
              + n * d_model * 4)
    out = pl.pallas_call(
        functools.partial(encoder_layer_kernel, num_heads=num_heads, d_k=d_k,
                          d_ff_chunk=d_ff_chunk, compute_dtype=compute_dtype),
        out_shape=jax.ShapeDtypeStruct((n, d_model), jnp.float32),
        grid=grid,
        in_specs=[row_spec(d_model),                    # h tile (residual)
                  head_tile,                            # Q rows (head-major)
                  head_full,                            # K (all keys, resident)
                  head_full,                            # V
                  full2d((d_model, d_model)),           # WO
                  full2d((1, d_model)), full2d((1, d_model)),    # ln1 g,b
                  full2d((d_model, d_ff)), full2d((1, d_ff)),    # w1, b1
                  full2d((d_ff, d_model)), full2d((1, d_model)), # w2, b2
                  full2d((1, d_model)), full2d((1, d_model))],   # ln2 g,b
        out_specs=row_spec(d_model),
        scratch_shapes=[pltpu.VMEM((bs, d_model), jnp.float32)],
        cost_estimate=pl.CostEstimate(flops=int(flops2),
                                      transcendentals=int(trans2),
                                      bytes_accessed=int(bytes2)),
        compiler_params=cparams,
    )(h, q, k, v, wo_c, lp['ln1_g'], lp['ln1_b'],
      w1_c, lp['b1'], w2_c, lp['b2'], lp['ln2_g'], lp['ln2_b'])
    return out


if __name__ == "__main__":
    d_input, d_model, n_cxt, h, L = 16, 32, 16, 4, 2
    d_k = d_model // h
    n = 8  # sequence length (<= n_cxt)

    key = jax.random.PRNGKey(0)
    kx, kp = jax.random.split(key)
    x = jax.random.normal(kx, (n, d_input), jnp.float32) * 0.1
    params = init_params(kp, d_input, d_model, n_cxt, h, L)

    out = transformer_forward(x, params, num_heads=h, d_k=d_k)
    out = jax.block_until_ready(out)
    assert out.shape == (n, d_model)
    assert bool(jnp.all(jnp.isfinite(out)))
    print("KERNEL_OK")
</pallas_src>

<mosaic_0001>
module attributes {stable_mosaic.version = 11 : i64} {
  func.func @embed_qkv_kernel(%arg0: i32, %arg1: memref<8x16xf32, #tpu.memory_space<vmem>>, %arg2: memref<16x32xbf16, #tpu.memory_space<vmem>>, %arg3: memref<8x32xf32, #tpu.memory_space<vmem>>, %arg4: memref<32x32xbf16, #tpu.memory_space<vmem>>, %arg5: memref<32x32xbf16, #tpu.memory_space<vmem>>, %arg6: memref<32x32xbf16, #tpu.memory_space<vmem>>, %arg7: memref<8x32xbf16, #tpu.memory_space<vmem>>, %arg8: memref<4x8x8xbf16, #tpu.memory_space<vmem>>, %arg9: memref<4x8x8xbf16, #tpu.memory_space<vmem>>, %arg10: memref<4x8x8xbf16, #tpu.memory_space<vmem>>) attributes {dimension_semantics = [#tpu.dimension_semantics<parallel>], iteration_bounds = array<i64: 1>, scalar_prefetch = 0 : i64, scratch_operands = 0 : i64, tpu.core_type = #tpu.core_type<tc>, window_params = [{transform_indices = @transform_0, window_bounds = array<i64: 8, 16>}, {pipeline_mode = #tpu.pipeline_mode<synchronous>, transform_indices = @transform_1, window_bounds = array<i64: 16, 32>}, {transform_indices = @transform_2, window_bounds = array<i64: 8, 32>}, {pipeline_mode = #tpu.pipeline_mode<synchronous>, transform_indices = @transform_3, window_bounds = array<i64: 32, 32>}, {pipeline_mode = #tpu.pipeline_mode<synchronous>, transform_indices = @transform_4, window_bounds = array<i64: 32, 32>}, {pipeline_mode = #tpu.pipeline_mode<synchronous>, transform_indices = @transform_5, window_bounds = array<i64: 32, 32>}, {transform_indices = @transform_6, window_bounds = array<i64: 8, 32>}, {transform_indices = @transform_7, window_bounds = array<i64: 4, 8, 8>}, {transform_indices = @transform_8, window_bounds = array<i64: 4, 8, 8>}, {transform_indices = @transform_9, window_bounds = array<i64: 4, 8, 8>}]} {
    %c0 = arith.constant 0 : index
    %c0_0 = arith.constant 0 : index
    %0 = vector.load %arg1[%c0, %c0_0] : memref<8x16xf32, #tpu.memory_space<vmem>>, vector<8x16xf32>
    %1 = arith.truncf %0 : vector<8x16xf32> to vector<8x16xbf16>
    %c0_1 = arith.constant 0 : index
    %c0_2 = arith.constant 0 : index
    %2 = vector.load %arg2[%c0_1, %c0_2] : memref<16x32xbf16, #tpu.memory_space<vmem>>, vector<16x32xbf16>
    %cst = arith.constant dense<0.000000e+00> : vector<8x32xf32>
    %3 = tpu.matmul %1, %2, %cst {dimension_numbers = #tpu.dot_dimension_numbers<[1], [0], [0], [1], [0, 0, 1, 1], [], []>} : vector<8x16xbf16>, vector<16x32xbf16>, vector<8x32xf32> -> vector<8x32xf32>
    %c0_3 = arith.constant 0 : index
    %c0_4 = arith.constant 0 : index
    %4 = vector.load %arg3[%c0_3, %c0_4] : memref<8x32xf32, #tpu.memory_space<vmem>>, vector<8x32xf32>
    %5 = arith.addf %3, %4 : vector<8x32xf32>
    %6 = arith.truncf %5 : vector<8x32xf32> to vector<8x32xbf16>
    %c0_5 = arith.constant 0 : index
    %c0_6 = arith.constant 0 : index
    %7 = vector.load %arg7[%c0_5, %c0_6] : memref<8x32xbf16, #tpu.memory_space<vmem>>, vector<8x32xbf16>
    tpu.vector_store %arg7[%c0_5, %c0_6], %6 {strides = array<i32>} : memref<8x32xbf16, #tpu.memory_space<vmem>>, vector<8x32xbf16>,
    %8 = arith.truncf %5 : vector<8x32xf32> to vector<8x32xbf16>
    %c0_7 = arith.constant 0 : index
    %c0_8 = arith.constant 0 : index
    %9 = vector.load %arg4[%c0_7, %c0_8] : memref<32x32xbf16, #tpu.memory_space<vmem>>, vector<32x32xbf16>
    %cst_9 = arith.constant dense<0.000000e+00> : vector<8x32xf32>
    %10 = tpu.matmul %8, %9, %cst_9 {dimension_numbers = #tpu.dot_dimension_numbers<[1], [0], [0], [1], [0, 0, 1, 1], [], []>} : vector<8x32xbf16>, vector<32x32xbf16>, vector<8x32xf32> -> vector<8x32xf32>
    %c0_10 = arith.constant 0 : index
    %c0_11 = arith.constant 0 : index
    %11 = vector.load %arg5[%c0_10, %c0_11] : memref<32x32xbf16, #tpu.memory_space<vmem>>, vector<32x32xbf16>
    %cst_12 = arith.constant dense<0.000000e+00> : vector<8x32xf32>
    %12 = tpu.matmul %8, %11, %cst_12 {dimension_numbers = #tpu.dot_dimension_numbers<[1], [0], [0], [1], [0, 0, 1, 1], [], []>} : vector<8x32xbf16>, vector<32x32xbf16>, vector<8x32xf32> -> vector<8x32xf32>
    %c0_13 = arith.constant 0 : index
    %c0_14 = arith.constant 0 : index
    %13 = vector.load %arg6[%c0_13, %c0_14] : memref<32x32xbf16, #tpu.memory_space<vmem>>, vector<32x32xbf16>
    %cst_15 = arith.constant dense<0.000000e+00> : vector<8x32xf32>
    %14 = tpu.matmul %8, %13, %cst_15 {dimension_numbers = #tpu.dot_dimension_numbers<[1], [0], [0], [1], [0, 0, 1, 1], [], []>} : vector<8x32xbf16>, vector<32x32xbf16>, vector<8x32xf32> -> vector<8x32xf32>
    %15 = vector.extract_strided_slice %10 {offsets = [0, 0], sizes = [8, 8], strides = [1, 1]} : vector<8x32xf32> to vector<8x8xf32>
    %16 = arith.truncf %15 : vector<8x8xf32> to vector<8x8xbf16>
    %c0_16 = arith.constant 0 : index
    %c0_17 = arith.constant 0 : index
    %c0_18 = arith.constant 0 : index
    %17 = vector.load %arg8[%c0_16, %c0_17, %c0_18] : memref<4x8x8xbf16, #tpu.memory_space<vmem>>, vector<1x8x8xbf16>
    %18 = vector.shape_cast %17 : vector<1x8x8xbf16> to vector<8x8xbf16>
    %19 = vector.shape_cast %16 : vector<8x8xbf16> to vector<1x8x8xbf16>
    tpu.vector_store %arg8[%c0_16, %c0_17, %c0_18], %19 {strides = array<i32>} : memref<4x8x8xbf16, #tpu.memory_space<vmem>>, vector<1x8x8xbf16>,
    %20 = vector.extract_strided_slice %12 {offsets = [0, 0], sizes = [8, 8], strides = [1, 1]} : vector<8x32xf32> to vector<8x8xf32>
    %21 = arith.truncf %20 : vector<8x8xf32> to vector<8x8xbf16>
    %c0_19 = arith.constant 0 : index
    %c0_20 = arith.constant 0 : index
    %c0_21 = arith.constant 0 : index
    %22 = vector.load %arg9[%c0_19, %c0_20, %c0_21] : memref<4x8x8xbf16, #tpu.memory_space<vmem>>, vector<1x8x8xbf16>
    %23 = vector.shape_cast %22 : vector<1x8x8xbf16> to vector<8x8xbf16>
    %24 = vector.shape_cast %21 : vector<8x8xbf16> to vector<1x8x8xbf16>
    tpu.vector_store %arg9[%c0_19, %c0_20, %c0_21], %24 {strides = array<i32>} : memref<4x8x8xbf16, #tpu.memory_space<vmem>>, vector<1x8x8xbf16>,
    %25 = vector.extract_strided_slice %14 {offsets = [0, 0], sizes = [8, 8], strides = [1, 1]} : vector<8x32xf32> to vector<8x8xf32>
    %26 = arith.truncf %25 : vector<8x8xf32> to vector<8x8xbf16>
    %c0_22 = arith.constant 0 : index
    %c0_23 = arith.constant 0 : index
    %c0_24 = arith.constant 0 : index
    %27 = vector.load %arg10[%c0_22, %c0_23, %c0_24] : memref<4x8x8xbf16, #tpu.memory_space<vmem>>, vector<1x8x8xbf16>
    %28 = vector.shape_cast %27 : vector<1x8x8xbf16> to vector<8x8xbf16>
    %29 = vector.shape_cast %26 : vector<8x8xbf16> to vector<1x8x8xbf16>
    tpu.vector_store %arg10[%c0_22, %c0_23, %c0_24], %29 {strides = array<i32>} : memref<4x8x8xbf16, #tpu.memory_space<vmem>>, vector<1x8x8xbf16>,
    %30 = vector.extract_strided_slice %10 {offsets = [0, 8], sizes = [8, 8], strides = [1, 1]} : vector<8x32xf32> to vector<8x8xf32>
    %31 = arith.truncf %30 : vector<8x8xf32> to vector<8x8xbf16>
    %c1 = arith.constant 1 : index
    %c0_25 = arith.constant 0 : index
    %c0_26 = arith.constant 0 : index
    %32 = vector.load %arg8[%c1, %c0_25, %c0_26] : memref<4x8x8xbf16, #tpu.memory_space<vmem>>, vector<1x8x8xbf16>
    %33 = vector.shape_cast %32 : vector<1x8x8xbf16> to vector<8x8xbf16>
    %34 = vector.shape_cast %31 : vector<8x8xbf16> to vector<1x8x8xbf16>
    tpu.vector_store %arg8[%c1, %c0_25, %c0_26], %34 {strides = array<i32>} : memref<4x8x8xbf16, #tpu.memory_space<vmem>>, vector<1x8x8xbf16>,
    %35 = vector.extract_strided_slice %12 {offsets = [0, 8], sizes = [8, 8], strides = [1, 1]} : vector<8x32xf32> to vector<8x8xf32>
    %36 = arith.truncf %35 : vector<8x8xf32> to vector<8x8xbf16>
    %c1_27 = arith.constant 1 : index
    %c0_28 = arith.constant 0 : index
    %c0_29 = arith.constant 0 : index
    %37 = vector.load %arg9[%c1_27, %c0_28, %c0_29] : memref<4x8x8xbf16, #tpu.memory_space<vmem>>, vector<1x8x8xbf16>
    %38 = vector.shape_cast %37 : vector<1x8x8xbf16> to vector<8x8xbf16>
    %39 = vector.shape_cast %36 : vector<8x8xbf16> to vector<1x8x8xbf16>
    tpu.vector_store %arg9[%c1_27, %c0_28, %c0_29], %39 {strides = array<i32>} : memref<4x8x8xbf16, #tpu.memory_space<vmem>>, vector<1x8x8xbf16>,
    %40 = vector.extract_strided_slice %14 {offsets = [0, 8], sizes = [8, 8], strides = [1, 1]} : vector<8x32xf32> to vector<8x8xf32>
    %41 = arith.truncf %40 : vector<8x8xf32> to vector<8x8xbf16>
    %c1_30 = arith.constant 1 : index
    %c0_31 = arith.constant 0 : index
    %c0_32 = arith.constant 0 : index
    %42 = vector.load %arg10[%c1_30, %c0_31, %c0_32] : memref<4x8x8xbf16, #tpu.memory_space<vmem>>, vector<1x8x8xbf16>
    %43 = vector.shape_cast %42 : vector<1x8x8xbf16> to vector<8x8xbf16>
    %44 = vector.shape_cast %41 : vector<8x8xbf16> to vector<1x8x8xbf16>
    tpu.vector_store %arg10[%c1_30, %c0_31, %c0_32], %44 {strides = array<i32>} : memref<4x8x8xbf16, #tpu.memory_space<vmem>>, vector<1x8x8xbf16>,
    %45 = vector.extract_strided_slice %10 {offsets = [0, 16], sizes = [8, 8], strides = [1, 1]} : vector<8x32xf32> to vector<8x8xf32>
    %46 = arith.truncf %45 : vector<8x8xf32> to vector<8x8xbf16>
    %c2 = arith.constant 2 : index
    %c0_33 = arith.constant 0 : index
    %c0_34 = arith.constant 0 : index
    %47 = vector.load %arg8[%c2, %c0_33, %c0_34] : memref<4x8x8xbf16, #tpu.memory_space<vmem>>, vector<1x8x8xbf16>
    %48 = vector.shape_cast %47 : vector<1x8x8xbf16> to vector<8x8xbf16>
    %49 = vector.shape_cast %46 : vector<8x8xbf16> to vector<1x8x8xbf16>
    tpu.vector_store %arg8[%c2, %c0_33, %c0_34], %49 {strides = array<i32>} : memref<4x8x8xbf16, #tpu.memory_space<vmem>>, vector<1x8x8xbf16>,
    %50 = vector.extract_strided_slice %12 {offsets = [0, 16], sizes = [8, 8], strides = [1, 1]} : vector<8x32xf32> to vector<8x8xf32>
    %51 = arith.truncf %50 : vector<8x8xf32> to vector<8x8xbf16>
    %c2_35 = arith.constant 2 : index
    %c0_36 = arith.constant 0 : index
    %c0_37 = arith.constant 0 : index
    %52 = vector.load %arg9[%c2_35, %c0_36, %c0_37] : memref<4x8x8xbf16, #tpu.memory_space<vmem>>, vector<1x8x8xbf16>
    %53 = vector.shape_cast %52 : vector<1x8x8xbf16> to vector<8x8xbf16>
    %54 = vector.shape_cast %51 : vector<8x8xbf16> to vector<1x8x8xbf16>
    tpu.vector_store %arg9[%c2_35, %c0_36, %c0_37], %54 {strides = array<i32>} : memref<4x8x8xbf16, #tpu.memory_space<vmem>>, vector<1x8x8xbf16>,
    %55 = vector.extract_strided_slice %14 {offsets = [0, 16], sizes = [8, 8], strides = [1, 1]} : vector<8x32xf32> to vector<8x8xf32>
    %56 = arith.truncf %55 : vector<8x8xf32> to vector<8x8xbf16>
    %c2_38 = arith.constant 2 : index
    %c0_39 = arith.constant 0 : index
    %c0_40 = arith.constant 0 : index
    %57 = vector.load %arg10[%c2_38, %c0_39, %c0_40] : memref<4x8x8xbf16, #tpu.memory_space<vmem>>, vector<1x8x8xbf16>
    %58 = vector.shape_cast %57 : vector<1x8x8xbf16> to vector<8x8xbf16>
    %59 = vector.shape_cast %56 : vector<8x8xbf16> to vector<1x8x8xbf16>
    tpu.vector_store %arg10[%c2_38, %c0_39, %c0_40], %59 {strides = array<i32>} : memref<4x8x8xbf16, #tpu.memory_space<vmem>>, vector<1x8x8xbf16>,
    %60 = vector.extract_strided_slice %10 {offsets = [0, 24], sizes = [8, 8], strides = [1, 1]} : vector<8x32xf32> to vector<8x8xf32>
    %61 = arith.truncf %60 : vector<8x8xf32> to vector<8x8xbf16>
    %c3 = arith.constant 3 : index
    %c0_41 = arith.constant 0 : index
    %c0_42 = arith.constant 0 : index
    %62 = vector.load %arg8[%c3, %c0_41, %c0_42] : memref<4x8x8xbf16, #tpu.memory_space<vmem>>, vector<1x8x8xbf16>
    %63 = vector.shape_cast %62 : vector<1x8x8xbf16> to vector<8x8xbf16>
    %64 = vector.shape_cast %61 : vector<8x8xbf16> to vector<1x8x8xbf16>
    tpu.vector_store %arg8[%c3, %c0_41, %c0_42], %64 {strides = array<i32>} : memref<4x8x8xbf16, #tpu.memory_space<vmem>>, vector<1x8x8xbf16>,
    %65 = vector.extract_strided_slice %12 {offsets = [0, 24], sizes = [8, 8], strides = [1, 1]} : vector<8x32xf32> to vector<8x8xf32>
    %66 = arith.truncf %65 : vector<8x8xf32> to vector<8x8xbf16>
    %c3_43 = arith.constant 3 : index
    %c0_44 = arith.constant 0 : index
    %c0_45 = arith.constant 0 : index
    %67 = vector.load %arg9[%c3_43, %c0_44, %c0_45] : memref<4x8x8xbf16, #tpu.memory_space<vmem>>, vector<1x8x8xbf16>
    %68 = vector.shape_cast %67 : vector<1x8x8xbf16> to vector<8x8xbf16>
    %69 = vector.shape_cast %66 : vector<8x8xbf16> to vector<1x8x8xbf16>
    tpu.vector_store %arg9[%c3_43, %c0_44, %c0_45], %69 {strides = array<i32>} : memref<4x8x8xbf16, #tpu.memory_space<vmem>>, vector<1x8x8xbf16>,
    %70 = vector.extract_strided_slice %14 {offsets = [0, 24], sizes = [8, 8], strides = [1, 1]} : vector<8x32xf32> to vector<8x8xf32>
    %71 = arith.truncf %70 : vector<8x8xf32> to vector<8x8xbf16>
    %c3_46 = arith.constant 3 : index
    %c0_47 = arith.constant 0 : index
    %c0_48 = arith.constant 0 : index
    %72 = vector.load %arg10[%c3_46, %c0_47, %c0_48] : memref<4x8x8xbf16, #tpu.memory_space<vmem>>, vector<1x8x8xbf16>
    %73 = vector.shape_cast %72 : vector<1x8x8xbf16> to vector<8x8xbf16>
    %74 = vector.shape_cast %71 : vector<8x8xbf16> to vector<1x8x8xbf16>
    tpu.vector_store %arg10[%c3_46, %c0_47, %c0_48], %74 {strides = array<i32>} : memref<4x8x8xbf16, #tpu.memory_space<vmem>>, vector<1x8x8xbf16>,
    return
  }
  func.func @transform_0(%arg0: i32) -> (i32, i32) {
    %c0_i32 = arith.constant 0 : i32
    %c0_i32_0 = arith.constant 0 : i32
    return %arg0, %c0_i32 : i32, i32
  }
  func.func @transform_1(%arg0: i32) -> (i32, i32) {
    %c0_i32 = arith.constant 0 : i32
    %c0_i32_0 = arith.constant 0 : i32
    %c0_i32_1 = arith.constant 0 : i32
    return %c0_i32, %c0_i32_0 : i32, i32
  }
  func.func @transform_2(%arg0: i32) -> (i32, i32) {
    %c0_i32 = arith.constant 0 : i32
    %c0_i32_0 = arith.constant 0 : i32
    return %arg0, %c0_i32 : i32, i32
  }
  func.func @transform_3(%arg0: i32) -> (i32, i32) {
    %c0_i32 = arith.constant 0 : i32
    %c0_i32_0 = arith.constant 0 : i32
    %c0_i32_1 = arith.constant 0 : i32
    return %c0_i32, %c0_i32_0 : i32, i32
  }
  func.func @transform_4(%arg0: i32) -> (i32, i32) {
    %c0_i32 = arith.constant 0 : i32
    %c0_i32_0 = arith.constant 0 : i32
    %c0_i32_1 = arith.constant 0 : i32
    return %c0_i32, %c0_i32_0 : i32, i32
  }
  func.func @transform_5(%arg0: i32) -> (i32, i32) {
    %c0_i32 = arith.constant 0 : i32
    %c0_i32_0 = arith.constant 0 : i32
    %c0_i32_1 = arith.constant 0 : i32
    return %c0_i32, %c0_i32_0 : i32, i32
  }
  func.func @transform_6(%arg0: i32) -> (i32, i32) {
    %c0_i32 = arith.constant 0 : i32
    %c0_i32_0 = arith.constant 0 : i32
    return %arg0, %c0_i32 : i32, i32
  }
  func.func @transform_7(%arg0: i32) -> (i32, i32, i32) {
    %c0_i32 = arith.constant 0 : i32
    %c0_i32_0 = arith.constant 0 : i32
    %c0_i32_1 = arith.constant 0 : i32
    return %c0_i32, %arg0, %c0_i32_0 : i32, i32, i32
  }
  func.func @transform_8(%arg0: i32) -> (i32, i32, i32) {
    %c0_i32 = arith.constant 0 : i32
    %c0_i32_0 = arith.constant 0 : i32
    %c0_i32_1 = arith.constant 0 : i32
    return %c0_i32, %arg0, %c0_i32_0 : i32, i32, i32
  }
  func.func @transform_9(%arg0: i32) -> (i32, i32, i32) {
    %c0_i32 = arith.constant 0 : i32
    %c0_i32_0 = arith.constant 0 : i32
    %c0_i32_1 = arith.constant 0 : i32
    return %c0_i32, %arg0, %c0_i32_0 : i32, i32, i32
  }
}

</mosaic_0001>

<bundles_post_ra>
// kernel: tpu_custom_call.1
= control target key start
LH: loop header
LB: loop body
LE: loop exit
PB: predicated region body
PF: predicated region fallthrough
CT: control target
= control target key end

     0   :  { %15 = vsyncpa [#allocation3], 0  ;;  %s898_s0 = inlined_call_operand.hbm [shape: f32[8,16], index: 0, kind: input, shape index: {}]   ;;  %s899_s1 = inlined_call_operand.hbm [shape: bf16[16,32], index: 1, kind: input, shape index: {}]   ;;  %s900_s2 = inlined_call_operand.hbm [shape: f32[16,32], index: 2, kind: input, shape index: {}]   ;;  %s901_s3 = inlined_call_operand.hbm [shape: bf16[32,32], index: 3, kind: input, shape index: {}]   ;;  %s902_s4 = inlined_call_operand.hbm [shape: bf16[32,32], index: 4, kind: input, shape index: {}]   ;;  %s903_s5 = inlined_call_operand.hbm [shape: bf16[32,32], index: 5, kind: input, shape index: {}]   ;;  %s904_s6 = inlined_call_operand.hbm [shape: bf16[8,32], index: 6, kind: output, shape index: {0}]   ;;  %s905_s7 = inlined_call_operand.hbm [shape: bf16[4,8,8], index: 7, kind: output, shape index: {1}]   ;;  %s906_s8 = inlined_call_operand.hbm [shape: bf16[4,8,8], index: 8, kind: output, shape index: {2}]   ;;  %s907_s9 = inlined_call_operand.hbm [shape: bf16[4,8,8], index: 9, kind: output, shape index: {3}]  }
   0x1   :  { %16 = vsyncpa [#allocation6], 0 }
   0x2   :  { %17 = vsyncpa [#allocation9], 0 }
   0x3   :  { %18 = vsyncpa [#allocation12], 0 }
   0x4   :  { %19 = vsyncpa [#allocation4], 0 }
   0x5   :  { %20 = vsyncpa [#allocation15], 0 }
   0x6   :  { %21 = vsyncpa [#allocation18], 0  ;;  %s761_s30 = smov [#allocation5]  }
   0x7   :  { %s37_s10 = sshll.u32 %s761_s30, 4  ;;  %s38_s10 = int_to_ptr.vmem [resolvable:$true] %s37_s10 }
   0x8   :  { %s555_s11 = scalar_lea.vmem %s38_s10, 128  ;;  %p560_p1 = scmp.lt.s32.totalorder %s38_s10, %s38_s10 }
   0x9   :  { %p556_p0 = scmp.ne.s32.totalorder %s38_s10, %s555_s11  ;;  %p561_p2 = scmp.lt.s32.totalorder %s555_s11, %s555_s11 }
   0xb   :  { %p562_p3 = por %p561_p2, %p560_p1 }
   0xd   :  { %p563_p4 = pnand %p562_p3, %p556_p0 }
   0xf   :  { %566 = shalt.err (!%p563_p4)
}
  0x10   :  { %s762_s12 = smov 64   ;;  %s763_s13 = smov 4  }
  0x11   :  { %43 = dma.hbm_to_vmem [thread:$0]  %s899_s1, 128, %s38_s10, [#allocation6], %s762_s12, %s762_s12, %s763_s13  }
  0x12   :  { %s764_s16 = smov [#allocation8]   ;;  %s765_s18 = smov [#allocation2]  }
  0x13   :  { %s59_s17 = sshll.u32 %s764_s16, 4  ;;  %s28_s19 = sshll.u32 %s765_s18, 4  ;;  %s60_s17 = int_to_ptr.vmem [resolvable:$true] %s59_s17  ;;  %s29_s19 = int_to_ptr.vmem [resolvable:$true] %s28_s19 }
  0x14   :  { %s575_s20 = scalar_lea.vmem %s60_s17, 256  ;;  %p580_p6 = scmp.lt.s32.totalorder %s60_s17, %s60_s17 }
  0x15   :  { %p576_p5 = scmp.ne.s32.totalorder %s60_s17, %s575_s20  ;;  %p581_p7 = scmp.lt.s32.totalorder %s575_s20, %s575_s20 }
  0x17   :  { %p582_p8 = por %p581_p7, %p580_p6 }
  0x19   :  { %p583_p9 = pnand %p582_p8, %p576_p5 }
  0x1b   :  { %586 = shalt.err (!%p583_p9)
}
  0x1c   :  { %65 = dma.hbm_to_vmem [thread:$0]  %s901_s3, 256, %s60_s17, [#allocation9], %s762_s12, %s762_s12, %s763_s13  }
  0x1d   :  { %s595_s1 = scalar_lea.vmem %s29_s19, 128  ;;  %p600_p11 = scmp.lt.s32.totalorder %s29_s19, %s29_s19 }
  0x1e   :  { %p596_p10 = scmp.ne.s32.totalorder %s29_s19, %s595_s1  ;;  %p601_p12 = scmp.lt.s32.totalorder %s595_s1, %s595_s1 }
  0x20   :  { %p602_p13 = por %p601_p12, %p600_p11 }
  0x22   :  { %p603_p0 = pnand %p602_p13, %p596_p10 }
  0x24   :  { %606 = shalt.err (!%p603_p0)
}
  0x25   :  { %31 = dma.hbm_to_vmem [thread:$0]  %s898_s0, 128, %s29_s19, [#allocation3]  }
  0x26   :  { %s766_s25 = smov [#allocation7]   ;;  %s767_s27 = smov [#allocation10]  }
  0x27   :  { %s50_s26 = sshll.u32 %s766_s25, 4  ;;  %s71_s28 = sshll.u32 %s767_s27, 4  ;;  %s51_s26 = int_to_ptr.vmem [resolvable:$true] %s50_s26  ;;  %s72_s28 = int_to_ptr.vmem [resolvable:$true] %s71_s28 }
  0x28   :  { %s615_s29 = scalar_lea.vmem %s51_s26, 128  ;;  %p620_p2 = scmp.lt.s32.totalorder %s51_s26, %s51_s26 }
  0x29   :  { %p616_p1 = scmp.ne.s32.totalorder %s51_s26, %s615_s29  ;;  %p621_p3 = scmp.lt.s32.totalorder %s615_s29, %s615_s29 }
  0x2b   :  { %p622_p4 = por %p621_p3, %p620_p2 }
  0x2d   :  { %p623_p5 = pnand %p622_p4, %p616_p1 }
  0x2f   :  { %626 = shalt.err (!%p623_p5)
}
  0x30   :  { %53 = dma.hbm_to_vmem [thread:$0]  %s900_s2, 128, %s51_s26, [#allocation6]  }
  0x31   :  { %s635_s10 = scalar_lea.vmem %s72_s28, 256  ;;  %p640_p7 = scmp.lt.s32.totalorder %s72_s28, %s72_s28 }
  0x32   :  { %p636_p6 = scmp.ne.s32.totalorder %s72_s28, %s635_s10  ;;  %p641_p8 = scmp.lt.s32.totalorder %s635_s10, %s635_s10 }
  0x34   :  { %p642_p9 = por %p641_p8, %p640_p7 }
  0x36   :  { %p643_p10 = pnand %p642_p9, %p636_p6 }
  0x38   :  { %646 = shalt.err (!%p643_p10)
}
  0x39   :  { %77 = dma.hbm_to_vmem [thread:$0]  %s902_s4, 256, %s72_s28, [#allocation9], %s762_s12, %s762_s12, %s763_s13  }
  0x3a   :  { %s768_s14 = smov [#allocation11]  }
  0x3b   :  { %s83_s15 = sshll.u32 %s768_s14, 4  ;;  %s84_s15 = int_to_ptr.vmem [resolvable:$true] %s83_s15 }
  0x3c   :  { %s655_s16 = scalar_lea.vmem %s84_s15, 256  ;;  %p660_p12 = scmp.lt.s32.totalorder %s84_s15, %s84_s15 }
  0x3d   :  { %p656_p11 = scmp.ne.s32.totalorder %s84_s15, %s655_s16  ;;  %p661_p13 = scmp.lt.s32.totalorder %s655_s16, %s655_s16 }
  0x3f   :  { %p662_p0 = por %p661_p13, %p660_p12 }
  0x41   :  { %p663_p1 = pnand %p662_p0, %p656_p11 }
  0x43   :  { %666 = shalt.err (!%p663_p1)
}
  0x44   :  { %89 = dma.hbm_to_vmem [thread:$0]  %s903_s5, 256, %s84_s15, [#allocation12], %s762_s12, %s762_s12, %s763_s13  }
  0x45   :  { %747 = dma.done.wait [#allocation3], 128  }
  0x46   :  { %748 = vsyncadd [#allocation3], 4294967168 }
  0x47   :  { %749 = dma.done.wait [#allocation6], 256  }
  0x48   :  { %750 = vsyncadd [#allocation6], 4294967040 }
  0x49   :  { %751 = dma.done.wait [#allocation9], 512  }
  0x4a   :  { %752 = vsyncadd [#allocation9], 4294966784 }
  0x4b   :  { %753 = dma.done.wait [#allocation12], 256  }
  0x4c   :  { %754 = vsyncadd [#allocation12], 4294967040  ;;  %v769_v0 = vmov 0.0   ;;  %vm770_vm0 = vmmov 0   ;;  %v540_v1 = vld [vmem:[#allocation5] sm:$0xff]   ;;  %v109_v2 = vld [vmem:[#allocation2] sm:$0xff] }
  0x4d   :  { %493 = vmatprep.subr.bf16.mxu0 %v769_v0  ;;  %495 = vmatprep.mubr.msk.bf16.mxu0 %vm770_vm0, %v769_v0  ;;  %v110_v3 = vpack.c.bf16 %v109_v2, %v109_v2  ;;  %vm120_vm1 = vcmask 130048   ;;  %v541_v4 = vld [vmem:[#allocation8 + $0x8] sm:$0xff]   ;;  %v542_v5 = vld [vmem:[#allocation10 + $0x8] sm:$0xff]   ;;  %v543_v6 = vld [vmem:[#allocation8] sm:$0xff]   ;;  %vm183_vm2 = vcmask 261120   ;;  %vm165_vm3 = vcmask 257024  }
  0x4e   :  { %499 = vmatprep.subr.bf16.mxu1 %v769_v0  ;;  %503 = vmatprep.mubr.msk.bf16.mxu1 %vm770_vm0, %v769_v0  ;;  %v544_v7 = vld [vmem:[#allocation10] sm:$0xff]   ;;  %v113_v8 = vld [vmem:[#allocation7] sm:$0xff]  ;;  %v545_v12 = vld [vmem:[#allocation11 + $0x8] sm:$0xff]   ;;  %vm340_vm4 = vcmask 60416   ;;  %s771_s4 = smov 104   ;;  %s772_s5 = smov 120  }
  0x4f   :  { %494 = vmatpush3.bf16.msra.mxu0 %v540_v1  ;;  %500 = vmatpush3.bf16.msra.mxu1 %v541_v4  ;;  %v546_v16 = vld [vmem:[#allocation11] sm:$0xff]   ;;  %s773_s18 = smov [#allocation13]   ;;  %s774_s20 = smov 112  }
  0x50   :  { %507 = vmatprep.subr.bf16.mxu0 %v769_v0  ;;  %501 = vmatprep.subr.bf16.mxu1 %v769_v0  ;;  %s406_s19 = sshll.u32 %s773_s18, 4  ;;  %s407_s19 = int_to_ptr.vmem [resolvable:$true] %s406_s19 }
  0x51   :  { %s667_s21 = scalar_lea.vmem %s407_s19, 64  ;;  %p672_p3 = scmp.lt.s32.totalorder %s407_s19, %s407_s19 }
  0x52   :  { %496 = vmatmul.mubr.msk.bf16.vlgmr.msra.gmra.mxu0 %vm120_vm1, %v110_v3  ;;  %p668_p2 = scmp.ne.s32.totalorder %s407_s19, %s667_s21  ;;  %p673_p4 = scmp.lt.s32.totalorder %s667_s21, %s667_s21 }
  0x53   :  { %508 = vmatpush3.bf16.msra.mxu0 %v542_v5  ;;  %511 = vmatprep.mubr.msk.bf16.mxu0 %vm770_vm0, %v769_v0 }
  0x54   :  { %509 = vmatprep.subr.bf16.mxu0 %v769_v0  ;;  %502 = vmatpush3.bf16.msra.mxu1 %v543_v6  ;;  %p674_p5 = por %p673_p4, %p672_p3 }
  0x55   :  { %515 = vmatprep.subr.bf16.mxu1 %v769_v0 }
  0x56   :  { %p675_p6 = pnand %p674_p5, %p668_p2 }
  0x57   :  { %510 = vmatpush3.bf16.msra.mxu0 %v544_v7 }
 0x112   :  { %v158_v9 = vpop.f32.mrf.mxu0 }
 0x113   :  { %v159_v10 = vadd.f32 %v158_v9, %v113_v8 }
 0x114   :  { %v497_v11 = vpop.f32.mrf.mxu0 }
 0x115   :  { %v164_v13 = vpack.c.bf16 %v159_v10, %v159_v10 }
 0x116   :  { %v161_v14 = vpop.f32.mrf.mxu0 }
 0x117   :  { %504 = vmatmul.mubr.msk.bf16.vlgmr.msra.gmra.mxu1 %vm183_vm2, %v164_v13  ;;  %512 = vmatmul.mubr.msk.bf16.vlgmr.msra.gmra.mxu0 %vm183_vm2, %v164_v13  ;;  %166 = vst.msk [vmem:[#allocation13] sm:$0xf] %vm165_vm3, %v164_v13 }
 0x118   :  { %516 = vmatpush3.bf16.msra.mxu1 %v545_v12  ;;  %v498_v15 = vpop.f32.mrf.mxu0  ;;  %519 = vmatprep.mubr.msk.bf16.mxu1 %vm770_vm0, %v769_v0 }
 0x119   :  { %517 = vmatprep.subr.bf16.mxu1 %v769_v0 }
 0x11c   :  { %518 = vmatpush3.bf16.msra.mxu1 %v546_v16 }
 0x11f   :  { %520 = vmatmul.mubr.msk.bf16.vlgmr.msra.gmra.mxu1 %vm183_vm2, %v164_v13 }
 0x1d7   :  { %v221_v17 = vpop.f32.mrf.mxu1  ;;  %v277_v18 = vpop.f32.mrf.mxu0 }
 0x1d8   :  { %v339_v19 = vpack.c.bf16 %v221_v17, %v221_v17  ;;  %v342_v20 = vpack.c.bf16 %v277_v18, %v277_v18 }
 0x1d9   :  { %v505_v21 = vpop.f32.mrf.mxu1  ;;  %v513_v22 = vpop.f32.mrf.mxu0 }
 0x1da   :  { %343 = vst.msk [vmem:[#allocation16] sm:$0xf] %vm340_vm4, %v342_v20  ;;  %341 = vst.msk [vmem:[#allocation14] sm:$0xf] %vm340_vm4, %v339_v19  ;;  %385 = vrot.lane.b32.xlu1 %v339_v19, %s771_s4  ;;  %349 = vrot.lane.b32.xlu0 %v339_v19, %s772_s5 }
 0x1db   :  { %v224_v23 = vpop.f32.mrf.mxu1  ;;  %v280_v24 = vpop.f32.mrf.mxu0 }
 0x1dd   :  { %v506_v25 = vpop.f32.mrf.mxu1  ;;  %v514_v26 = vpop.f32.mrf.mxu0 }
 0x1de   :  { %370 = vrot.lane.b32.xlu0 %v339_v19, %s774_s20  ;;  %357 = vrot.lane.b32.xlu1 %v342_v20, %s772_s5 }
 0x1df   :  { %678 = shalt.err (!%p675_p6)
}
 0x1e0   :  { %409 = dma.vmem_to_hbm [thread:$0]  %s407_s19, 64, %s904_s6, [#allocation4]   ;;  %v333_v27 = vpop.f32.mrf.mxu1 }
 0x1e1   :  { %v344_v28 = vpack.c.bf16 %v333_v27, %v333_v27  ;;  %s775_s23 = smov [#allocation14]  }
 0x1e2   :  { %v521_v29 = vpop.f32.mrf.mxu1  ;;  %375 = vrot.lane.b32.xlu1 %v342_v20, %s774_s20  ;;  %s415_s24 = sshll.u32 %s775_s23, 4  ;;  %s416_s24 = int_to_ptr.vmem [resolvable:$true] %s415_s24 }
 0x1e3   :  { %345 = vst.msk [vmem:[#allocation17] sm:$0xf] %vm340_vm4, %v344_v28  ;;  %365 = vrot.lane.b32.xlu0 %v344_v28, %s772_s5  ;;  %s687_s6 = scalar_lea.vmem %s416_s24, 256  ;;  %p692_p8 = scmp.lt.s32.totalorder %s416_s24, %s416_s24 }
 0x1e4   :  { %v336_v30 = vpop.f32.mrf.mxu1  ;;  %p688_p7 = scmp.ne.s32.totalorder %s416_s24, %s687_s6  ;;  %p693_p9 = scmp.lt.s32.totalorder %s687_s6, %s687_s6 }
 0x1e6   :  { %v522_v31 = vpop.f32.mrf.mxu1  ;;  %390 = vrot.lane.b32.xlu1 %v342_v20, %s771_s4  ;;  %p694_p10 = por %p693_p9, %p692_p8 }
 0x1e7   :  { %380 = vrot.lane.b32.xlu0 %v344_v28, %s774_s20 }
 0x1e8   :  { %p695_p11 = pnand %p694_p10, %p688_p7 }
 0x1eb   :  { %395 = vrot.lane.b32.xlu0 %v344_v28, %s771_s4 }
 0x24c   :  { %v386_v32 = vpop.permute.xlu1 %385  ;;  %v350_v33 = vpop.permute.xlu0 %349 }
 0x24d   :  { %389 = vst.msk [vmem:[#allocation14 + $0xc] sm:$0xf] %vm340_vm4, %v386_v32  ;;  %353 = vst.msk [vmem:[#allocation14 + $0x4] sm:$0xf] %vm340_vm4, %v350_v33 }
 0x250   :  { %v371_v34 = vpop.permute.xlu0 %370  ;;  %v358_v35 = vpop.permute.xlu1 %357 }
 0x251   :  { %374 = vst.msk [vmem:[#allocation14 + $0x8] sm:$0xf] %vm340_vm4, %v371_v34  ;;  %361 = vst.msk [vmem:[#allocation16 + $0x4] sm:$0xf] %vm340_vm4, %v358_v35 }
 0x252   :  { %698 = shalt.err (!%p695_p11)
}
 0x253   :  { %421 = dma.vmem_to_hbm [thread:$0]  %s416_s24, 256, %s905_s7, [#allocation15], %s762_s12, %s762_s12, %s763_s13  }
 0x254   :  { %v376_v37 = vpop.permute.xlu1 %375  ;;  %s776_s27 = smov [#allocation16]   ;;  %s777_s29 = smov [#allocation17]  }
 0x255   :  { %v366_v36 = vpop.permute.xlu0 %365  ;;  %s427_s28 = sshll.u32 %s776_s27, 4  ;;  %379 = vst.msk [vmem:[#allocation16 + $0x8] sm:$0xf] %vm340_vm4, %v376_v37  ;;  %s439_s3 = sshll.u32 %s777_s29, 4  ;;  %s428_s28 = int_to_ptr.vmem [resolvable:$true] %s427_s28  ;;  %s440_s3 = int_to_ptr.vmem [resolvable:$true] %s439_s3 }
 0x256   :  { %369 = vst.msk [vmem:[#allocation17 + $0x4] sm:$0xf] %vm340_vm4, %v366_v36  ;;  %s707_s30 = scalar_lea.vmem %s428_s28, 256  ;;  %p712_p13 = scmp.lt.s32.totalorder %s428_s28, %s428_s28 }
 0x257   :  { %p708_p12 = scmp.ne.s32.totalorder %s428_s28, %s707_s30  ;;  %p713_p0 = scmp.lt.s32.totalorder %s707_s30, %s707_s30 }
 0x258   :  { %v391_v39 = vpop.permute.xlu1 %390 }
 0x259   :  { %v381_v38 = vpop.permute.xlu0 %380  ;;  %394 = vst.msk [vmem:[#allocation16 + $0xc] sm:$0xf] %vm340_vm4, %v391_v39  ;;  %p714_p1 = por %p713_p0, %p712_p13 }
 0x25a   :  { %384 = vst.msk [vmem:[#allocation17 + $0x8] sm:$0xf] %vm340_vm4, %v381_v38 }
 0x25b   :  { %p715_p2 = pnand %p714_p1, %p708_p12 }
 0x25d   :  { %718 = shalt.err (!%p715_p2)
}
 0x25e   :  { %433 = dma.vmem_to_hbm [thread:$0]  %s428_s28, 256, %s906_s8, [#allocation15], %s762_s12, %s762_s12, %s763_s13   ;;  %v396_v40 = vpop.permute.xlu0 %395 }
 0x25f   :  { %399 = vst.msk [vmem:[#allocation17 + $0xc] sm:$0xf] %vm340_vm4, %v396_v40  ;;  %s727_s0 = scalar_lea.vmem %s440_s3, 256  ;;  %p732_p4 = scmp.lt.s32.totalorder %s440_s3, %s440_s3 }
 0x260   :  { %p728_p3 = scmp.ne.s32.totalorder %s440_s3, %s727_s0  ;;  %p733_p5 = scmp.lt.s32.totalorder %s727_s0, %s727_s0 }
 0x262   :  { %p734_p6 = por %p733_p5, %p732_p4 }
 0x264   :  { %p735_p7 = pnand %p734_p6, %p728_p3 }
 0x266   :  { %738 = shalt.err (!%p735_p7)
}
 0x267   :  { %445 = dma.vmem_to_hbm [thread:$0]  %s440_s3, 256, %s907_s9, [#allocation18], %s762_s12, %s762_s12, %s763_s13  }
 0x268   :  { %755 = dma.done.wait [#allocation4], 64  }
 0x269   :  { %756 = vsyncadd [#allocation4], 4294967232 }
 0x26a   :  { %757 = dma.done.wait [#allocation15], 512  }
 0x26b   :  { %758 = vsyncadd [#allocation15], 4294966784 }
 0x26c   :  { %759 = dma.done.wait [#allocation18], 256  }
 0x26d   :  { %760 = vsyncadd [#allocation18], 4294967040 }
 0x26e   :  { %458 = vsyncpa [#allocation3], 1 }
 0x26f   :  { %459 = vsyncpa [#allocation6], 1 }
 0x270   :  { %460 = vsyncpa [#allocation9], 1 }
 0x271   :  { %461 = vsyncpa [#allocation12], 1 }
 0x272   :  { %462 = vsyncpa [#allocation4], 1 }
 0x273   :  { %463 = vsyncpa [#allocation15], 1 }
 0x274   :  { %464 = vsyncpa [#allocation18], 1 }

</bundles_post_ra>
